<compile_context>
chip_gen: v7x
topology: tpu7x:2x2x1
jax: 0.10.0
libtpu: 0.0.40
codegen_flags: <defaults>
</compile_context>

<pallas_src>
import jax
import jax.numpy as jnp
import numpy as np
from jax import lax
from jax.experimental import pallas as pl
from jax.experimental.pallas import tpu as pltpu

# ---- model / problem sizes (fixed config of the module) ----
N = 2            # batch
S = 8            # encoder input_length
L = 2            # num_layers
H = 32           # hidden_size
D = 2            # encoder directions (bidirectionality == 'YES')
HD = H * D       # encoder output feature size
E = 16           # embedding_size
V = 20           # input_size == output_size (synthetic len(vocabulary_tam))
O = V
HCAT = H * (D + 1)           # energy-linear input width (== 3H here)
G4 = 4 * H                   # fused gate width per layer: [rz | n_x | n_h]

OUT_LANES = 128              # lane-dense output width (== 4H)
OUT_ROWS = 8                 # per-step output rows (N logits rows, zero padded)

# packed-weight row offsets inside wpack (all multiples of 8 -> aligned sublane slices)
R_W0 = 0
R_W1 = R_W0 + HD + H         # 96   fused layer-0 weights: rows = [context | h0]
R_FC = R_W1 + 2 * H          # 160  fused layer-1 weights: rows = [hn0 | h1]
R_END = R_FC + H             # 192  fc weight (zero padded to 128 lanes)

assert S % L == 0 and L == 2           # exact attention-repeat collapse + eh selection below
assert G4 == OUT_LANES and O <= OUT_LANES and N <= OUT_ROWS


def decoder_fused_kernel(bias0_ref, h0_ref, enc_ref, wpack_ref, misc_ref,
                         pred_ref, hidfin_ref):
    T = bias0_ref.shape[0]

    # ---- resident weights / loop-invariant terms (hoisted out of the step loop) ----
    enc = enc_ref[...]                                     # (S, N, HD)
    w0 = wpack_ref[R_W0:R_W1, :]                           # (HD+H, 4H)  fused layer-0
    w1 = wpack_ref[R_W1:R_FC, :]                           # (2H, 4H)    fused layer-1
    wfc = wpack_ref[R_FC:R_END, :]                         # (H, 128)    fc (zero padded)
    bias1 = misc_ref[0:1, :]                               # (1, 4H)
    b_fc = misc_ref[1:2, :]                                # (1, 128)
    w_eh = misc_ref[2:3, 0:H].reshape(1, 1, H)             # energy weight, hidden part
    w_ee = misc_ref[3:4, 0:HD].reshape(1, 1, HD)           # energy weight, encoder part
    b_e = misc_ref[4:5, 0:1]                               # (1, 1)

    # encoder contribution to the attention energy does not change across decode steps
    ee = jnp.sum(enc * w_ee, axis=-1)                      # (S, N)
    row = lax.broadcasted_iota(jnp.int32, (S, N), 0)
    row_even = (row % L) == 0
    pad_rows = jnp.zeros((OUT_ROWS - N, OUT_LANES), jnp.float32)

    def gru_gates(g, h_prev):
        # g columns: [r | z | n_x | n_h]; PyTorch GRU semantics
        rz = jax.nn.sigmoid(g[:, 0:2 * H])                 # one EUP call for r and z
        r = rz[:, 0:H]
        z = rz[:, H:2 * H]
        n = jnp.tanh(g[:, 2 * H:3 * H] + r * g[:, 3 * H:4 * H])
        return (1.0 - z) * n + z * h_prev

    def step(t, hid):                                      # hid: (L, N, H) in registers
        # ---------------- attention ----------------
        eh = jnp.sum(hid * w_eh, axis=-1)                  # (L, N)
        # torch's hidden.repeat(S)/enc.repeat(L) pairs encoder position s with hidden layer
        # (s mod L); since L | S the softmax over S rows equals the reference softmax over L*S.
        energy = jnp.maximum(
            jnp.where(row_even, eh[0:1, :], eh[1:2, :]) + ee + b_e, 0.0)      # (S, N)
        m = jnp.max(energy, axis=0, keepdims=True)
        a = jnp.exp(energy - m)
        inv = pl.reciprocal(jnp.sum(a, axis=0, keepdims=True), approx=True)
        scores = a * inv                                                      # (S, N)
        context = jnp.sum(enc * scores[:, :, None], axis=0)                   # (N, HD)

        # -------- GRU layer 0: one fused matmul on [context | h0]; embedding term is bias0[t] ----
        g0 = jnp.dot(jnp.concatenate([context, hid[0]], axis=-1), w0,
                     preferred_element_type=jnp.float32) + bias0_ref[t]       # (N, 4H)
        hn0 = gru_gates(g0, hid[0])

        # -------- GRU layer 1: one fused matmul on [hn0 | h1] (inter-layer dropout p=0) --------
        g1 = jnp.dot(jnp.concatenate([hn0, hid[1]], axis=-1), w1,
                     preferred_element_type=jnp.float32) + bias1              # (N, 4H)
        hn1 = gru_gates(g1, hid[1])

        # -------- fc + single full-block lane-dense store --------
        pred = jnp.dot(hn1, wfc, preferred_element_type=jnp.float32) + b_fc   # (N, 128)
        idx = pl.multiple_of(t * OUT_ROWS, OUT_ROWS)
        pred_ref[pl.ds(idx, OUT_ROWS), :] = jnp.concatenate([pred, pad_rows], axis=0)

        return jnp.stack([hn0, hn1], axis=0)               # carry (L, N, H)

    hid_fin = lax.fori_loop(0, T, step, h0_ref[...], unroll=True)
    hidfin_ref[...] = hid_fin


def _decode_pallas_call(T):
    return pl.pallas_call(
        decoder_fused_kernel,
        grid=(1,),
        in_specs=[
            pl.BlockSpec((T, N, OUT_LANES), lambda i: (0, 0, 0)),   # per-step layer-0 bias stream
            pl.BlockSpec((L, N, H), lambda i: (0, 0, 0)),           # initial hidden
            pl.BlockSpec((S, N, HD), lambda i: (0, 0, 0)),          # encoder outputs (resident)
            pl.BlockSpec((R_END, OUT_LANES), lambda i: (0, 0)),     # fused GRU/FC weights
            pl.BlockSpec((8, OUT_LANES), lambda i: (0, 0)),         # biases + attention params
        ],
        out_specs=(
            pl.BlockSpec((T * OUT_ROWS, OUT_LANES), lambda i: (0, 0)),
            pl.BlockSpec((L, N, H), lambda i: (0, 0, 0)),
        ),
        out_shape=(
            jax.ShapeDtypeStruct((T * OUT_ROWS, OUT_LANES), jnp.float32),
            jax.ShapeDtypeStruct((L, N, H), jnp.float32),
        ),
        compiler_params=pltpu.CompilerParams(dimension_semantics=("arbitrary",)),
    )


def pack_decoder_params(params):
    """One-time host-side packing of all weights into resident VMEM buffers."""
    w_ih0 = params['w_ih0']                                  # (3H, HD+E); rnn_input = [ctx | emb]
    w_ctx_T = w_ih0[:, :HD].T                                # (HD, 3H)
    w_emb_T = w_ih0[:, HD:].T                                # (E, 3H)

    def fuse(w_x_T, w_h_T):
        # (Kx, 3H), (H, 3H) -> (Kx+H, 4H) with columns [rz (x+h) | n_x | n_h]
        kx = w_x_T.shape[0]
        top = jnp.concatenate([w_x_T[:, :2 * H], w_x_T[:, 2 * H:],
                               jnp.zeros((kx, H), jnp.float32)], axis=1)
        bot = jnp.concatenate([w_h_T[:, :2 * H], jnp.zeros((H, H), jnp.float32),
                               w_h_T[:, 2 * H:]], axis=1)
        return jnp.concatenate([top, bot], axis=0)

    w0f = fuse(w_ctx_T, params['w_hh0'].T)                   # (96, 128)
    w1f = fuse(params['w_ih1'].T, params['w_hh1'].T)         # (64, 128)
    wfc = jnp.pad(params['w_fc'].T, ((0, 0), (0, OUT_LANES - O)))   # (32, 128)
    wpack = jnp.concatenate([w0f, w1f, wfc], axis=0).astype(jnp.float32)   # (192, 128)

    b_ih1, b_hh1 = params['b_ih1'], params['b_hh1']
    bias1 = jnp.concatenate([b_ih1[:2 * H] + b_hh1[:2 * H], b_ih1[2 * H:], b_hh1[2 * H:]])

    misc = jnp.zeros((8, OUT_LANES), jnp.float32)
    misc = misc.at[0, :].set(bias1)
    misc = misc.at[1, :O].set(params['b_fc'])
    misc = misc.at[2, :H].set(params['w_energy'][0, :H])     # w_eh
    misc = misc.at[3, :HD].set(params['w_energy'][0, H:])    # w_ee
    misc = misc.at[4, 0].set(params['b_energy'][0])

    # Per-token layer-0 bias table: embedding contribution to the gates, biases folded in.
    # (dropout p=0 on the embedding -> identity, so this folding is exact.)
    b_ih0, b_hh0 = params['b_ih0'], params['b_hh0']
    gx_tok = params['emb_table'] @ w_emb_T + b_ih0           # (V, 3H)
    tok_bias = jnp.concatenate([
        gx_tok[:, :2 * H] + b_hh0[:2 * H],                   # rz: gx_rz + b_hh0_rz
        gx_tok[:, 2 * H:],                                   # n_x: gx_n (incl. b_ih0_n)
        jnp.broadcast_to(b_hh0[2 * H:], (V, H)),             # n_h: b_hh0_n
    ], axis=1).astype(jnp.float32)                           # (V, 128)

    return {'wpack': wpack, 'misc': misc, 'tok_bias': tok_bias}


def decoder_decode_pallas(x_seq, encoder_outputs, hidden, packed):
    """T teacher-forced decode steps fused in one kernel launch (state carried in registers)."""
    T = int(x_seq.shape[0])
    bias0 = packed['tok_bias'][x_seq]                        # (T, N, 4H) gather, one XLA op
    out_pred, hidden_new = _decode_pallas_call(T)(
        bias0, hidden, encoder_outputs, packed['wpack'], packed['misc'])
    preds = out_pred.reshape(T, OUT_ROWS, OUT_LANES)[:, :N, :O]       # (T, N, O)
    return preds, hidden_new


def decoder_forward_pallas(x_tok, encoder_outputs, hidden, packed):
    """Single decode step — exact semantics of Decoder.forward (GRU, eval mode)."""
    preds, hidden_new = decoder_decode_pallas(x_tok[None, :], encoder_outputs, hidden, packed)
    return preds[0], hidden_new


def decoder_forward_reference(x_tok, encoder_outputs, hidden, params):
    # Pure-JAX mirror of the PyTorch forward (GRU, eval mode).
    emb = params['emb_table'][x_tok][None]                   # (1, N, E)
    enc_rep = jnp.tile(encoder_outputs, (L, 1, 1))
    hid_rep = jnp.tile(hidden, (S, 1, 1))
    cat = jnp.concatenate([hid_rep, enc_rep], axis=2)
    energy = jax.nn.relu(jnp.einsum('snc,oc->sno', cat, params['w_energy']) + params['b_energy'])
    scores = jax.nn.softmax(energy, axis=0)
    context = jnp.einsum('snk,snl->knl', scores, enc_rep)
    x_in = jnp.concatenate([context, emb], axis=2)[0]        # (N, HD+E)
    new_h = []
    for l in range(L):
        wih, whh = params[f'w_ih{l}'], params[f'w_hh{l}']
        bih, bhh = params[f'b_ih{l}'], params[f'b_hh{l}']
        h_prev = hidden[l]
        gx = x_in @ wih.T + bih
        gh = h_prev @ whh.T + bhh
        r = jax.nn.sigmoid(gx[:, :H] + gh[:, :H])
        z = jax.nn.sigmoid(gx[:, H:2 * H] + gh[:, H:2 * H])
        nc = jnp.tanh(gx[:, 2 * H:] + r * gh[:, 2 * H:])
        h_l = (1.0 - z) * nc + z * h_prev
        new_h.append(h_l)
        x_in = h_l
    pred = x_in @ params['w_fc'].T + params['b_fc']
    return pred, jnp.stack(new_h, axis=0)


def init_params(key):
    ks = jax.random.split(key, 13)
    sc = 0.1

    def rnd(k, shape):
        return jax.random.normal(k, shape, jnp.float32) * sc

    return {
        'emb_table': rnd(ks[0], (V, E)),
        'w_energy': rnd(ks[1], (1, HCAT)),
        'b_energy': rnd(ks[2], (1,)),
        'w_ih0': rnd(ks[3], (3 * H, HD + E)),
        'w_hh0': rnd(ks[4], (3 * H, H)),
        'b_ih0': rnd(ks[5], (3 * H,)),
        'b_hh0': rnd(ks[6], (3 * H,)),
        'w_ih1': rnd(ks[7], (3 * H, H)),
        'w_hh1': rnd(ks[8], (3 * H, H)),
        'b_ih1': rnd(ks[9], (3 * H,)),
        'b_hh1': rnd(ks[10], (3 * H,)),
        'w_fc': rnd(ks[11], (O, H)),
        'b_fc': rnd(ks[12], (O,)),
    }


if __name__ == "__main__":
    key = jax.random.PRNGKey(0)
    kp, kx, ke, kh, ksq = jax.random.split(key, 5)
    params = init_params(kp)
    packed = pack_decoder_params(params)

    x_tok = jax.random.randint(kx, (N,), 0, V)                    # decoder input tokens
    encoder_outputs = jax.random.normal(ke, (S, N, HD), jnp.float32) * 0.5
    hidden = jax.random.normal(kh, (L, N, H), jnp.float32) * 0.5

    # --- single decode step (== Decoder.forward) ---
    pred, hidden_new = decoder_forward_pallas(x_tok, encoder_outputs, hidden, packed)
    jax.block_until_ready((pred, hidden_new))

    with jax.default_matmul_precision('highest'):
        pred_ref, hidden_ref = decoder_forward_reference(x_tok, encoder_outputs, hidden, params)

    assert pred.shape == (N, O) and hidden_new.shape == (L, N, H)
    np.testing.assert_allclose(np.asarray(pred), np.asarray(pred_ref), rtol=2e-3, atol=2e-3)
    np.testing.assert_allclose(np.asarray(hidden_new), np.asarray(hidden_ref), rtol=2e-3, atol=2e-3)

    # --- fused multi-step decode: T forward steps inside ONE kernel launch ---
    T = 8
    x_seq = jax.random.randint(ksq, (T, N), 0, V)
    preds_seq, hidden_fin = decoder_decode_pallas(x_seq, encoder_outputs, hidden, packed)
    jax.block_until_ready((preds_seq, hidden_fin))

    with jax.default_matmul_precision('highest'):
        h_ref = hidden
        preds_ref = []
        for t in range(T):
            p_t, h_ref = decoder_forward_reference(x_seq[t], encoder_outputs, h_ref, params)
            preds_ref.append(p_t)
        preds_ref = jnp.stack(preds_ref, axis=0)

    np.testing.assert_allclose(np.asarray(preds_seq), np.asarray(preds_ref), rtol=3e-3, atol=3e-3)
    np.testing.assert_allclose(np.asarray(hidden_fin), np.asarray(h_ref), rtol=3e-3, atol=3e-3)

    print("KERNEL_OK")
</pallas_src>

<mosaic_0001>
module attributes {stable_mosaic.version = 11 : i64} {
  func.func @decoder_fused_kernel(%arg0: i32, %arg1: memref<1x2x128xf32, #tpu.memory_space<vmem>>, %arg2: memref<2x2x32xf32, #tpu.memory_space<vmem>>, %arg3: memref<8x2x64xf32, #tpu.memory_space<vmem>>, %arg4: memref<192x128xf32, #tpu.memory_space<vmem>>, %arg5: memref<8x128xf32, #tpu.memory_space<vmem>>, %arg6: memref<8x128xf32, #tpu.memory_space<vmem>>, %arg7: memref<2x2x32xf32, #tpu.memory_space<vmem>>) attributes {dimension_semantics = [#tpu.dimension_semantics<arbitrary>], iteration_bounds = array<i64: 1>, scalar_prefetch = 0 : i64, scratch_operands = 0 : i64, tpu.core_type = #tpu.core_type<tc>, window_params = [{pipeline_mode = #tpu.pipeline_mode<synchronous>, transform_indices = @transform_0, window_bounds = array<i64: 1, 2, 128>}, {pipeline_mode = #tpu.pipeline_mode<synchronous>, transform_indices = @transform_1, window_bounds = array<i64: 2, 2, 32>}, {pipeline_mode = #tpu.pipeline_mode<synchronous>, transform_indices = @transform_2, window_bounds = array<i64: 8, 2, 64>}, {pipeline_mode = #tpu.pipeline_mode<synchronous>, transform_indices = @transform_3, window_bounds = array<i64: 192, 128>}, {pipeline_mode = #tpu.pipeline_mode<synchronous>, transform_indices = @transform_4, window_bounds = array<i64: 8, 128>}, {pipeline_mode = #tpu.pipeline_mode<synchronous>, transform_indices = @transform_5, window_bounds = array<i64: 8, 128>}, {pipeline_mode = #tpu.pipeline_mode<synchronous>, transform_indices = @transform_6, window_bounds = array<i64: 2, 2, 32>}]} {
    %c0 = arith.constant 0 : index
    %c0_0 = arith.constant 0 : index
    %c0_1 = arith.constant 0 : index
    %0 = vector.load %arg3[%c0, %c0_0, %c0_1] : memref<8x2x64xf32, #tpu.memory_space<vmem>>, vector<8x2x64xf32>
    %c0_2 = arith.constant 0 : index
    %c0_3 = arith.constant 0 : index
    %1 = vector.load %arg4[%c0_2, %c0_3] : memref<192x128xf32, #tpu.memory_space<vmem>>, vector<96x128xf32>
    %c96 = arith.constant 96 : index
    %c0_4 = arith.constant 0 : index
    %2 = vector.load %arg4[%c96, %c0_4] : memref<192x128xf32, #tpu.memory_space<vmem>>, vector<64x128xf32>
    %c160 = arith.constant 160 : index
    %c0_5 = arith.constant 0 : index
    %3 = vector.load %arg4[%c160, %c0_5] : memref<192x128xf32, #tpu.memory_space<vmem>>, vector<32x128xf32>
    %c0_6 = arith.constant 0 : index
    %c0_7 = arith.constant 0 : index
    %4 = vector.load %arg5[%c0_6, %c0_7] : memref<8x128xf32, #tpu.memory_space<vmem>>, vector<1x128xf32>
    %c1 = arith.constant 1 : index
    %c0_8 = arith.constant 0 : index
    %5 = vector.load %arg5[%c1, %c0_8] : memref<8x128xf32, #tpu.memory_space<vmem>>, vector<1x128xf32>
    %c2 = arith.constant 2 : index
    %c0_9 = arith.constant 0 : index
    %6 = vector.load %arg5[%c2, %c0_9] : memref<8x128xf32, #tpu.memory_space<vmem>>, vector<1x32xf32>
    %7 = vector.shape_cast %6 : vector<1x32xf32> to vector<1x1x32xf32>
    %c3 = arith.constant 3 : index
    %c0_10 = arith.constant 0 : index
    %8 = vector.load %arg5[%c3, %c0_10] : memref<8x128xf32, #tpu.memory_space<vmem>>, vector<1x64xf32>
    %9 = vector.shape_cast %8 : vector<1x64xf32> to vector<1x1x64xf32>
    %c4 = arith.constant 4 : index
    %c0_11 = arith.constant 0 : index
    %10 = vector.load %arg5[%c4, %c0_11] : memref<8x128xf32, #tpu.memory_space<vmem>>, vector<1x1xf32>
    %11 = vector.broadcast %9 : vector<1x1x64xf32> to vector<8x2x64xf32>
    %12 = arith.mulf %0, %11 : vector<8x2x64xf32>
    %cst = arith.constant dense<0.000000e+00> : vector<8x2xf32>
    %13 = vector.multi_reduction <add>, %12, %cst [2] : vector<8x2x64xf32> to vector<8x2xf32>
    %14 = tpu.iota {dimensions = array<i32: 0>} : vector<8x2xi32>
    %c2_i32 = arith.constant 2 : i32
    %c0_i32 = arith.constant 0 : i32
    %15 = arith.cmpi eq, %c2_i32, %c0_i32 : i32
    %c1_i32 = arith.constant 1 : i32
    %16 = arith.select %15, %c1_i32, %c2_i32 : i32
    %17 = vector.broadcast %16 : i32 to vector<8x2xi32>
    %18 = arith.remsi %14, %17 : vector<8x2xi32>
    %c0_i32_12 = arith.constant 0 : i32
    %19 = vector.broadcast %c0_i32_12 : i32 to vector<8x2xi32>
    %20 = arith.cmpi ne, %18, %19 : vector<8x2xi32>
    %c0_i32_13 = arith.constant 0 : i32
    %21 = vector.broadcast %c0_i32_13 : i32 to vector<8x2xi32>
    %22 = arith.cmpi slt, %18, %21 : vector<8x2xi32>
    %c0_i32_14 = arith.constant 0 : i32
    %23 = arith.cmpi slt, %16, %c0_i32_14 : i32
    %24 = vector.broadcast %23 : i1 to vector<8x2xi1>
    %25 = vector.broadcast %24 : vector<8x2xi1> to vector<8x2xi1>
    %26 = arith.xori %22, %25 : vector<8x2xi1>
    %27 = arith.andi %26, %20 : vector<8x2xi1>
    %28 = vector.broadcast %16 : i32 to vector<8x2xi32>
    %29 = arith.addi %18, %28 : vector<8x2xi32>
    %30 = arith.select %27, %29, %18 : vector<8x2xi1>, vector<8x2xi32>
    %c0_i32_15 = arith.constant 0 : i32
    %31 = vector.broadcast %c0_i32_15 : i32 to vector<8x2xi32>
    %32 = arith.cmpi eq, %30, %31 : vector<8x2xi32>
    %cst_16 = arith.constant 0.000000e+00 : f32
    %33 = vector.broadcast %cst_16 : f32 to vector<6x128xf32>
    %c0_17 = arith.constant 0 : index
    %c0_18 = arith.constant 0 : index
    %c0_19 = arith.constant 0 : index
    %34 = vector.load %arg2[%c0_17, %c0_18, %c0_19] : memref<2x2x32xf32, #tpu.memory_space<vmem>>, vector<2x2x32xf32>
    %c0_i32_20 = arith.constant 0 : i32
    %35 = vector.broadcast %7 : vector<1x1x32xf32> to vector<2x2x32xf32>
    %36 = arith.mulf %34, %35 : vector<2x2x32xf32>
    %cst_21 = arith.constant dense<0.000000e+00> : vector<2x2xf32>
    %37 = vector.multi_reduction <add>, %36, %cst_21 [2] : vector<2x2x32xf32> to vector<2x2xf32>
    %38 = vector.extract_strided_slice %37 {offsets = [0, 0], sizes = [1, 2], strides = [1, 1]} : vector<2x2xf32> to vector<1x2xf32>
    %39 = vector.extract_strided_slice %37 {offsets = [1, 0], sizes = [1, 2], strides = [1, 1]} : vector<2x2xf32> to vector<1x2xf32>
    %40 = vector.shape_cast %38 : vector<1x2xf32> to vector<1x2xf32>
    %41 = vector.broadcast %40 : vector<1x2xf32> to vector<8x2xf32>
    %42 = vector.shape_cast %39 : vector<1x2xf32> to vector<1x2xf32>
    %43 = vector.broadcast %42 : vector<1x2xf32> to vector<8x2xf32>
    %44 = arith.select %32, %41, %43 : vector<8x2xi1>, vector<8x2xf32>
    %45 = arith.addf %44, %13 : vector<8x2xf32>
    %46 = vector.broadcast %10 : vector<1x1xf32> to vector<8x2xf32>
    %47 = arith.addf %45, %46 : vector<8x2xf32>
    %cst_22 = arith.constant 0.000000e+00 : f32
    %48 = vector.broadcast %cst_22 : f32 to vector<8x2xf32>
    %49 = arith.maximumf %47, %48 : vector<8x2xf32>
    %cst_23 = arith.constant dense<0xFF800000> : vector<2xf32>
    %50 = vector.multi_reduction <maximumf>, %49, %cst_23 [0] : vector<8x2xf32> to vector<2xf32>
    %51 = vector.shape_cast %50 : vector<2xf32> to vector<1x2xf32>
    %52 = vector.broadcast %51 : vector<1x2xf32> to vector<8x2xf32>
    %53 = arith.subf %49, %52 : vector<8x2xf32>
    %54 = math.exp %53 : vector<8x2xf32>
    %cst_24 = arith.constant dense<0.000000e+00> : vector<2xf32>
    %55 = vector.multi_reduction <add>, %54, %cst_24 [0] : vector<8x2xf32> to vector<2xf32>
    %56 = vector.shape_cast %55 : vector<2xf32> to vector<1x2xf32>
    %57 = tpu.reciprocal %56 {approx = true} : vector<1x2xf32> -> vector<1x2xf32>
    %58 = vector.broadcast %57 : vector<1x2xf32> to vector<8x2xf32>
    %59 = arith.mulf %54, %58 : vector<8x2xf32>
    %60 = vector.shape_cast %59 : vector<8x2xf32> to vector<8x2x1xf32>
    %61 = vector.broadcast %60 : vector<8x2x1xf32> to vector<8x2x64xf32>
    %62 = arith.mulf %0, %61 : vector<8x2x64xf32>
    %cst_25 = arith.constant dense<0.000000e+00> : vector<2x64xf32>
    %63 = vector.multi_reduction <add>, %62, %cst_25 [0] : vector<8x2x64xf32> to vector<2x64xf32>
    %64 = vector.extract_strided_slice %34 {offsets = [0, 0, 0], sizes = [1, 2, 32], strides = [1, 1, 1]} : vector<2x2x32xf32> to vector<1x2x32xf32>
    %65 = vector.shape_cast %64 : vector<1x2x32xf32> to vector<2x32xf32>
    %66 = tpu.concatenate %63, %65 in 1 : vector<2x64xf32>, vector<2x32xf32> -> vector<2x96xf32>
    %cst_26 = arith.constant dense<0.000000e+00> : vector<2x128xf32>
    %67 = tpu.matmul %66, %1, %cst_26 {dimension_numbers = #tpu.dot_dimension_numbers<[1], [0], [0], [1], [0, 0, 1, 1], [], []>} : vector<2x96xf32>, vector<96x128xf32>, vector<2x128xf32> -> vector<2x128xf32>
    %68 = arith.index_cast %c0_i32_20 : i32 to index
    %c0_27 = arith.constant 0 : index
    %c0_28 = arith.constant 0 : index
    %69 = vector.load %arg1[%68, %c0_27, %c0_28] : memref<1x2x128xf32, #tpu.memory_space<vmem>>, vector<1x2x128xf32>
    %70 = vector.shape_cast %69 : vector<1x2x128xf32> to vector<2x128xf32>
    %71 = arith.addf %67, %70 : vector<2x128xf32>
    %72 = vector.extract_strided_slice %34 {offsets = [0, 0, 0], sizes = [1, 2, 32], strides = [1, 1, 1]} : vector<2x2x32xf32> to vector<1x2x32xf32>
    %73 = vector.shape_cast %72 : vector<1x2x32xf32> to vector<2x32xf32>
    %74 = vector.extract_strided_slice %71 {offsets = [0, 0], sizes = [2, 64], strides = [1, 1]} : vector<2x128xf32> to vector<2x64xf32>
    %75 = arith.negf %74 : vector<2x64xf32>
    %76 = math.exp %75 : vector<2x64xf32>
    %cst_29 = arith.constant 1.000000e+00 : f32
    %77 = vector.broadcast %cst_29 : f32 to vector<2x64xf32>
    %78 = arith.addf %77, %76 : vector<2x64xf32>
    %79 = arith.divf %77, %78 : vector<2x64xf32>
    %80 = vector.extract_strided_slice %79 {offsets = [0, 0], sizes = [2, 32], strides = [1, 1]} : vector<2x64xf32> to vector<2x32xf32>
    %81 = vector.extract_strided_slice %79 {offsets = [0, 32], sizes = [2, 32], strides = [1, 1]} : vector<2x64xf32> to vector<2x32xf32>
    %82 = vector.extract_strided_slice %71 {offsets = [0, 64], sizes = [2, 32], strides = [1, 1]} : vector<2x128xf32> to vector<2x32xf32>
    %83 = vector.extract_strided_slice %71 {offsets = [0, 96], sizes = [2, 32], strides = [1, 1]} : vector<2x128xf32> to vector<2x32xf32>
    %84 = arith.mulf %80, %83 : vector<2x32xf32>
    %85 = arith.addf %82, %84 : vector<2x32xf32>
    %86 = math.tanh %85 : vector<2x32xf32>
    %cst_30 = arith.constant 1.000000e+00 : f32
    %87 = vector.broadcast %cst_30 : f32 to vector<2x32xf32>
    %88 = arith.subf %87, %81 : vector<2x32xf32>
    %89 = arith.mulf %88, %86 : vector<2x32xf32>
    %90 = arith.mulf %81, %73 : vector<2x32xf32>
    %91 = arith.addf %89, %90 : vector<2x32xf32>
    %92 = vector.extract_strided_slice %34 {offsets = [1, 0, 0], sizes = [1, 2, 32], strides = [1, 1, 1]} : vector<2x2x32xf32> to vector<1x2x32xf32>
    %93 = vector.shape_cast %92 : vector<1x2x32xf32> to vector<2x32xf32>
    %94 = tpu.concatenate %91, %93 in 1 : vector<2x32xf32>, vector<2x32xf32> -> vector<2x64xf32>
    %cst_31 = arith.constant dense<0.000000e+00> : vector<2x128xf32>
    %95 = tpu.matmul %94, %2, %cst_31 {dimension_numbers = #tpu.dot_dimension_numbers<[1], [0], [0], [1], [0, 0, 1, 1], [], []>} : vector<2x64xf32>, vector<64x128xf32>, vector<2x128xf32> -> vector<2x128xf32>
    %96 = vector.broadcast %4 : vector<1x128xf32> to vector<2x128xf32>
    %97 = arith.addf %95, %96 : vector<2x128xf32>
    %98 = vector.extract_strided_slice %34 {offsets = [1, 0, 0], sizes = [1, 2, 32], strides = [1, 1, 1]} : vector<2x2x32xf32> to vector<1x2x32xf32>
    %99 = vector.shape_cast %98 : vector<1x2x32xf32> to vector<2x32xf32>
    %100 = vector.extract_strided_slice %97 {offsets = [0, 0], sizes = [2, 64], strides = [1, 1]} : vector<2x128xf32> to vector<2x64xf32>
    %101 = arith.negf %100 : vector<2x64xf32>
    %102 = math.exp %101 : vector<2x64xf32>
    %cst_32 = arith.constant 1.000000e+00 : f32
    %103 = vector.broadcast %cst_32 : f32 to vector<2x64xf32>
    %104 = arith.addf %103, %102 : vector<2x64xf32>
    %105 = arith.divf %103, %104 : vector<2x64xf32>
    %106 = vector.extract_strided_slice %105 {offsets = [0, 0], sizes = [2, 32], strides = [1, 1]} : vector<2x64xf32> to vector<2x32xf32>
    %107 = vector.extract_strided_slice %105 {offsets = [0, 32], sizes = [2, 32], strides = [1, 1]} : vector<2x64xf32> to vector<2x32xf32>
    %108 = vector.extract_strided_slice %97 {offsets = [0, 64], sizes = [2, 32], strides = [1, 1]} : vector<2x128xf32> to vector<2x32xf32>
    %109 = vector.extract_strided_slice %97 {offsets = [0, 96], sizes = [2, 32], strides = [1, 1]} : vector<2x128xf32> to vector<2x32xf32>
    %110 = arith.mulf %106, %109 : vector<2x32xf32>
    %111 = arith.addf %108, %110 : vector<2x32xf32>
    %112 = math.tanh %111 : vector<2x32xf32>
    %cst_33 = arith.constant 1.000000e+00 : f32
    %113 = vector.broadcast %cst_33 : f32 to vector<2x32xf32>
    %114 = arith.subf %113, %107 : vector<2x32xf32>
    %115 = arith.mulf %114, %112 : vector<2x32xf32>
    %116 = arith.mulf %107, %99 : vector<2x32xf32>
    %117 = arith.addf %115, %116 : vector<2x32xf32>
    %cst_34 = arith.constant dense<0.000000e+00> : vector<2x128xf32>
    %118 = tpu.matmul %117, %3, %cst_34 {dimension_numbers = #tpu.dot_dimension_numbers<[1], [0], [0], [1], [0, 0, 1, 1], [], []>} : vector<2x32xf32>, vector<32x128xf32>, vector<2x128xf32> -> vector<2x128xf32>
    %119 = vector.broadcast %5 : vector<1x128xf32> to vector<2x128xf32>
    %120 = arith.addf %118, %119 : vector<2x128xf32>
    %c8_i32 = arith.constant 8 : i32
    %121 = arith.muli %c0_i32_20, %c8_i32 : i32
    %122 = tpu.assume_multiple %121, 8 : i32
    %123 = tpu.concatenate %120, %33 in 0 : vector<2x128xf32>, vector<6x128xf32> -> vector<8x128xf32>
    %124 = arith.index_cast %122 : i32 to index
    %c0_35 = arith.constant 0 : index
    %125 = vector.load %arg6[%124, %c0_35] : memref<8x128xf32, #tpu.memory_space<vmem>>, vector<8x128xf32>
    tpu.vector_store %arg6[%124, %c0_35], %123 {strides = array<i32>} : memref<8x128xf32, #tpu.memory_space<vmem>>, vector<8x128xf32>,
    %126 = vector.shape_cast %91 : vector<2x32xf32> to vector<1x2x32xf32>
    %127 = vector.shape_cast %117 : vector<2x32xf32> to vector<1x2x32xf32>
    %128 = tpu.concatenate %126, %127 in 0 : vector<1x2x32xf32>, vector<1x2x32xf32> -> vector<2x2x32xf32>
    %c1_i32_36 = arith.constant 1 : i32
    %c0_37 = arith.constant 0 : index
    %c0_38 = arith.constant 0 : index
    %c0_39 = arith.constant 0 : index
    %129 = vector.load %arg7[%c0_37, %c0_38, %c0_39] : memref<2x2x32xf32, #tpu.memory_space<vmem>>, vector<2x2x32xf32>
    tpu.vector_store %arg7[%c0_37, %c0_38, %c0_39], %128 {strides = array<i32>} : memref<2x2x32xf32, #tpu.memory_space<vmem>>, vector<2x2x32xf32>,
    return
  }
  func.func @transform_0(%arg0: i32) -> (i32, i32, i32) {
    %c0_i32 = arith.constant 0 : i32
    %c0_i32_0 = arith.constant 0 : i32
    %c0_i32_1 = arith.constant 0 : i32
    %c0_i32_2 = arith.constant 0 : i32
    return %c0_i32, %c0_i32_0, %c0_i32_1 : i32, i32, i32
  }
  func.func @transform_1(%arg0: i32) -> (i32, i32, i32) {
    %c0_i32 = arith.constant 0 : i32
    %c0_i32_0 = arith.constant 0 : i32
    %c0_i32_1 = arith.constant 0 : i32
    %c0_i32_2 = arith.constant 0 : i32
    return %c0_i32, %c0_i32_0, %c0_i32_1 : i32, i32, i32
  }
  func.func @transform_2(%arg0: i32) -> (i32, i32, i32) {
    %c0_i32 = arith.constant 0 : i32
    %c0_i32_0 = arith.constant 0 : i32
    %c0_i32_1 = arith.constant 0 : i32
    %c0_i32_2 = arith.constant 0 : i32
    return %c0_i32, %c0_i32_0, %c0_i32_1 : i32, i32, i32
  }
  func.func @transform_3(%arg0: i32) -> (i32, i32) {
    %c0_i32 = arith.constant 0 : i32
    %c0_i32_0 = arith.constant 0 : i32
    %c0_i32_1 = arith.constant 0 : i32
    return %c0_i32, %c0_i32_0 : i32, i32
  }
  func.func @transform_4(%arg0: i32) -> (i32, i32) {
    %c0_i32 = arith.constant 0 : i32
    %c0_i32_0 = arith.constant 0 : i32
    %c0_i32_1 = arith.constant 0 : i32
    return %c0_i32, %c0_i32_0 : i32, i32
  }
  func.func @transform_5(%arg0: i32) -> (i32, i32) {
    %c0_i32 = arith.constant 0 : i32
    %c0_i32_0 = arith.constant 0 : i32
    %c0_i32_1 = arith.constant 0 : i32
    return %c0_i32, %c0_i32_0 : i32, i32
  }
  func.func @transform_6(%arg0: i32) -> (i32, i32, i32) {
    %c0_i32 = arith.constant 0 : i32
    %c0_i32_0 = arith.constant 0 : i32
    %c0_i32_1 = arith.constant 0 : i32
    %c0_i32_2 = arith.constant 0 : i32
    return %c0_i32, %c0_i32_0, %c0_i32_1 : i32, i32, i32
  }
}

</mosaic_0001>

<bundles_post_ra>
// kernel: tpu_custom_call.1
= control target key start
LH: loop header
LB: loop body
LE: loop exit
PB: predicated region body
PF: predicated region fallthrough
CT: control target
= control target key end

     0   :  { %12 = vsyncpa [#allocation3], 0  ;;  %s1264_s0 = inlined_call_operand.hbm [shape: f32[1,2,128], index: 0, kind: input, shape index: {}]   ;;  %s1265_s1 = inlined_call_operand.hbm [shape: f32[2,2,32], index: 1, kind: input, shape index: {}]   ;;  %s1266_s2 = inlined_call_operand.hbm [shape: f32[8,2,64], index: 2, kind: input, shape index: {}]   ;;  %s1267_s3 = inlined_call_operand.hbm [shape: f32[192,128], index: 3, kind: input, shape index: {}]   ;;  %s1268_s4 = inlined_call_operand.vmem [shape: f32[8,128], index: 4, kind: input, shape index: {}]   ;;  %s1269_s5 = inlined_call_operand.hbm [shape: f32[8,128], index: 5, kind: output, shape index: {0}]   ;;  %s1270_s6 = inlined_call_operand.hbm [shape: f32[2,2,32], index: 6, kind: output, shape index: {1}]  }
   0x1   :  { %13 = vsyncpa [#allocation6], 0 }
   0x2   :  { %14 = vsyncpa [#allocation9], 0 }
   0x3   :  { %15 = vsyncpa [#allocation4], 0 }
   0x4   :  { %16 = vsyncpa [#allocation12], 0  ;;  %s1012_s21 = smov [#allocation5]   ;;  %s870_s25 = scalar_lea.hbm %s1265_s1, 64 }
   0x5   :  { %s32_s22 = sshll.u32 %s1012_s21, 4  ;;  %p871_p0 = scmp.ne.s32.totalorder %s1265_s1, %s870_s25  ;;  %s33_s22 = int_to_ptr.vmem [resolvable:$true] %s32_s22 }
   0x6   :  { %p874_p1 = scmp.lt.u32.totalorder %s870_s25, %s1265_s1 }
   0x8   :  { %p876_p2 = pnand %p874_p1, %p871_p0 }
   0xa   :  { %879 = shalt.err (!%p876_p2)
}
   0xb   :  { %s880_s30 = scalar_lea.vmem %s33_s22, 64  ;;  %p885_p4 = scmp.lt.s32.totalorder %s33_s22, %s33_s22 }
   0xc   :  { %p881_p3 = scmp.ne.s32.totalorder %s33_s22, %s880_s30  ;;  %p886_p5 = scmp.lt.s32.totalorder %s880_s30, %s880_s30 }
   0xe   :  { %p887_p6 = por %p886_p5, %p885_p4 }
  0x10   :  { %p888_p7 = pnand %p887_p6, %p881_p3 }
  0x12   :  { %891 = shalt.err (!%p888_p7)
}
  0x13   :  { %s1013_s7 = smov 32   ;;  %s1014_s8 = smov 2  }
  0x14   :  { %38 = dma.hbm_to_vmem [thread:$0]  %s1265_s1, 64, %s33_s22, [#allocation6], %s1013_s7, %s1013_s7, %s1014_s8  }
  0x15   :  { %s1015_s11 = smov [#allocation2]   ;;  %s1016_s13 = smov [#allocation7]  }
  0x16   :  { %s23_s12 = sshll.u32 %s1015_s11, 4  ;;  %s44_s14 = sshll.u32 %s1016_s13, 4  ;;  %s24_s12 = int_to_ptr.vmem [resolvable:$true] %s23_s12  ;;  %s45_s14 = int_to_ptr.vmem [resolvable:$true] %s44_s14 }
  0x17   :  { %s892_s17 = scalar_lea.hbm %s1264_s0, 32 }
  0x18   :  { %p893_p8 = scmp.ne.s32.totalorder %s1264_s0, %s892_s17  ;;  %p896_p9 = scmp.lt.u32.totalorder %s892_s17, %s1264_s0 }
  0x1a   :  { %p898_p10 = pnand %p896_p9, %p893_p8 }
  0x1c   :  { %901 = shalt.err (!%p898_p10)
}
  0x1d   :  { %s902_s1 = scalar_lea.vmem %s24_s12, 32  ;;  %p907_p12 = scmp.lt.s32.totalorder %s24_s12, %s24_s12 }
  0x1e   :  { %p903_p11 = scmp.ne.s32.totalorder %s24_s12, %s902_s1  ;;  %p908_p13 = scmp.lt.s32.totalorder %s902_s1, %s902_s1 }
  0x20   :  { %p909_p0 = por %p908_p13, %p907_p12 }
  0x22   :  { %p910_p1 = pnand %p909_p0, %p903_p11 }
  0x24   :  { %913 = shalt.err (!%p910_p1)
}
  0x25   :  { %26 = dma.hbm_to_vmem [thread:$0]  %s1264_s0, 32, %s24_s12, [#allocation3]  }
  0x26   :  { %s914_s26 = scalar_lea.hbm %s1266_s2, 256 }
  0x27   :  { %p915_p2 = scmp.ne.s32.totalorder %s1266_s2, %s914_s26  ;;  %p918_p3 = scmp.lt.u32.totalorder %s914_s26, %s1266_s2 }
  0x29   :  { %p920_p4 = pnand %p918_p3, %p915_p2 }
  0x2b   :  { %923 = shalt.err (!%p920_p4)
}
  0x2c   :  { %s924_s9 = scalar_lea.vmem %s45_s14, 256  ;;  %p929_p6 = scmp.lt.s32.totalorder %s45_s14, %s45_s14 }
  0x2d   :  { %p925_p5 = scmp.ne.s32.totalorder %s45_s14, %s924_s9  ;;  %p930_p7 = scmp.lt.s32.totalorder %s924_s9, %s924_s9 }
  0x2f   :  { %p931_p8 = por %p930_p7, %p929_p6 }
  0x31   :  { %p932_p9 = pnand %p931_p8, %p925_p5 }
  0x33   :  { %935 = shalt.err (!%p932_p9)
}
  0x34   :  { %50 = dma.hbm_to_vmem [thread:$0]  %s1266_s2, 256, %s45_s14, [#allocation6], %s1013_s7, %s1013_s7, %s1014_s8  }
  0x35   :  { %s1017_s11 = smov [#allocation8]   ;;  %s936_s16 = scalar_lea.hbm %s1267_s3, 3072 }
  0x36   :  { %s56_s12 = sshll.u32 %s1017_s11, 4  ;;  %p937_p10 = scmp.ne.s32.totalorder %s1267_s3, %s936_s16  ;;  %s57_s12 = int_to_ptr.vmem [resolvable:$true] %s56_s12 }
  0x37   :  { %p940_p11 = scmp.lt.u32.totalorder %s936_s16, %s1267_s3 }
  0x39   :  { %p942_p12 = pnand %p940_p11, %p937_p10 }
  0x3b   :  { %945 = shalt.err (!%p942_p12)
}
  0x3c   :  { %s946_s21 = scalar_lea.vmem %s57_s12, 3072  ;;  %p951_p0 = scmp.lt.s32.totalorder %s57_s12, %s57_s12 }
  0x3d   :  { %p947_p13 = scmp.ne.s32.totalorder %s57_s12, %s946_s21  ;;  %p952_p1 = scmp.lt.s32.totalorder %s946_s21, %s946_s21 }
  0x3f   :  { %p953_p2 = por %p952_p1, %p951_p0 }
  0x41   :  { %p954_p3 = pnand %p953_p2, %p947_p13 }
  0x43   :  { %957 = shalt.err (!%p954_p3)
}
  0x44   :  { %s1018_s2 = smov 128   ;;  %s1019_s14 = smov 8  }
  0x45   :  { %62 = dma.hbm_to_vmem [thread:$0]  %s1267_s3, 3072, %s57_s12, [#allocation9], %s1018_s2, %s1018_s2, %s1019_s14  }
  0x46   :  { %1002 = dma.done.wait [#allocation3], 32  }
  0x47   :  { %1003 = vsyncadd [#allocation3], 4294967264 }
  0x48   :  { %1004 = dma.done.wait [#allocation6], 320  }
  0x49   :  { %1005 = vsyncadd [#allocation6], 4294966976 }
  0x4a   :  { %1006 = dma.done.wait [#allocation9], 3072  }
  0x4b   :  { %1007 = vsyncadd [#allocation9], 4294964224  ;;  %vm126_vm0 = vcmask 517120   ;;  %v1116_v0 = vld [vmem:[#allocation7 + $0x4] sm:$0x3]  ;;  %vm174_vm1 = vcmask 254976   ;;  %v151_v37 = vlaneseq }
  0x4c   :  { %v708_v1 = vld [vmem:[%s1268_s4 + $0x3] ss:$0 sm:$0xff]  ;;  %v1121_v2 = vld [vmem:[#allocation7] sm:$0x3]  ;;  %v1125_v5 = vld [vmem:[#allocation7 + $0x6] sm:$0x3] }
  0x4d   :  { %v120_v3 = vmul.f32 %v708_v1, %v1116_v0  ;;  %v118_v4 = vmul.f32 %v708_v1, %v1121_v2  ;;  %v1127_v6 = vld [vmem:[#allocation7 + $0x2] sm:$0x3]  ;;  %v121_v7 = vmul.f32 %v708_v1, %v1125_v5  ;;  %v1131_v9 = vld [vmem:[#allocation7 + $0xa] sm:$0x3]  ;;  %v1133_v10 = vld [vmem:[#allocation7 + $0x8] sm:$0x3] }
  0x4e   :  { %v119_v8 = vmul.f32 %v708_v1, %v1127_v6  ;;  %v123_v15 = vmul.f32 %v708_v1, %v1131_v9  ;;  %v122_v16 = vmul.f32 %v708_v1, %v1133_v10  ;;  %v113_v17 = vld [vmem:[%s1268_s4 + $0x4] sm:$0x1]  ;;  %v1144_v18 = vld [vmem:[#allocation7 + $0xe] sm:$0x3]  ;;  %v1146_v19 = vld [vmem:[#allocation7 + $0xc] sm:$0x3] }
  0x4f   :  { %v133_v11 = vsel %vm126_vm0, %v120_v3, 0.0  ;;  %v127_v12 = vsel %vm126_vm0, %v118_v4, 0.0  ;;  %v136_v13 = vsel %vm126_vm0, %v121_v7, 0.0  ;;  %837 = vpush %v113_v17  ;;  %v125_v22 = vmul.f32 %v708_v1, %v1144_v18  ;;  %v709_v24 = vld [vmem:[%s1268_s4 + $0x2] ss:$0 sm:$0xff]  ;;  %v86_v34 = vld [vmem:[#allocation8 + $0x8] sm:$0xff] }
  0x50   :  { %134 = vadd.xlane.f32.xlu1 %v133_v11  ;;  %128 = vadd.xlane.f32.xlu0 %v127_v12  ;;  %v130_v14 = vsel %vm126_vm0, %v119_v8, 0.0  ;;  %v142_v20 = vsel %vm126_vm0, %v123_v15, 0.0  ;;  %v139_v21 = vsel %vm126_vm0, %v122_v16, 0.0  ;;  %v124_v23 = vmul.f32 %v708_v1, %v1146_v19  ;;  %v1155_v25 = vld [vmem:[#allocation5 + $0x2] sm:$0x3]  ;;  %v85_v33 = vld [vmem:[#allocation8] sm:$0xff] }
  0x51   :  { %v1157_v26 = vld [vmem:[#allocation5] sm:$0x3]  ;;  %v148_v27 = vsel %vm126_vm0, %v125_v22, 0.0  ;;  %v173_v29 = vmul.f32 %v709_v24, %v1155_v25  ;;  %v1020_v35 = vmov 0.0|0.0   ;;  %v802_v36 = vpack.c.bf16 %v86_v34, %v85_v33  ;;  %s1023_s29 = smov 64   ;;  %s1024_s30 = smov 96  }
  0x52   :  { %v145_v28 = vsel %vm126_vm0, %v124_v23, 0.0  ;;  %v172_v30 = vmul.f32 %v709_v24, %v1157_v26  ;;  %801 = vmatprep.subr.bf16.mxu0 %v1020_v35  ;;  %819 = vmatprep.subr.bf16.mxu1 %v1020_v35  ;;  %v1168_v38 = vshrl.u32 %v151_v37, 7  ;;  %v183_v39 = vand.u32 127, %v151_v37  ;;  %s1025_s10 = smov [#allocation11]  }
  0x53   :  { %v178_v31 = vsel %vm174_vm1, %v173_v29, 0.0  ;;  %803 = vmatpush3.bf16.msra.mxu0 %v802_v36  ;;  %vm188_vm2 = vcmask 1041409   ;;  %vm189_vm3 = vcmask 1042434   ;;  %vm191_vm4 = vcmask 1043459   ;;  %s690_s11 = sshll.u32 %s1025_s10, 4  ;;  %s691_s11 = int_to_ptr.vmem [resolvable:$true] %s690_s11 }
  0x54   :  { %137 = vadd.xlane.f32.xlu1 %v136_v13  ;;  %131 = vadd.xlane.f32.xlu0 %v130_v14  ;;  %v175_v32 = vsel %vm174_vm1, %v172_v30, 0.0  ;;  %v186_v42 = vsub.s32 %v183_v39, %v1168_v38  ;;  %vm193_vm5 = vcmask 1044484   ;;  %vm195_vm6 = vcmask 1045509   ;;  %v87_v39 = vld [vmem:[#allocation8 + $0x10] sm:$0xff]  ;;  %s958_s12 = scalar_lea.vmem %s691_s11, 64  ;;  %p963_p5 = scmp.lt.s32.totalorder %s691_s11, %s691_s11 }
  0x55   :  { %804 = vmatprep.subr.bf16.mxu0 %v1020_v35  ;;  %v157_v59 = vand.u32 1, %v1168_v38  ;;  %vm197_vm7 = vcmask 1046534   ;;  %vm199_vm9 = vcmask 1047559   ;;  %vm270_vm10 = vcmask 15360   ;;  %p959_p4 = scmp.ne.s32.totalorder %s691_s11, %s958_s12  ;;  %p964_p6 = scmp.lt.s32.totalorder %s958_s12, %s958_s12 }
  0x56   :  { %vm1021_vm11 = vmmov 0   ;;  %vm373_vm12 = vcmask 523264   ;;  %vm376_vm13 = vcmask 785408   ;;  %vm486_vm14 = vcmask 261120  }
  0x57   :  { %vm165_vm8 = vcmp.eq.s32.totalorder %v157_v59, 0  ;;  %p965_p7 = por %p964_p6, %p963_p5 }
  0x58   :  { %143 = vadd.xlane.f32.xlu1 %v142_v20  ;;  %140 = vadd.xlane.f32.xlu0 %v139_v21 }
  0x59   :  { %p966_p8 = pnand %p965_p7, %p959_p4 }
  0x5c   :  { %149 = vadd.xlane.f32.xlu1 %v148_v27  ;;  %146 = vadd.xlane.f32.xlu0 %v145_v28 }
  0x60   :  { %179 = vadd.xlane.f32.xlu1 %v178_v31  ;;  %176 = vadd.xlane.f32.xlu0 %v175_v32 }
  0x80   :  { %s838_s28 = spop %837 }
  0x81   :  { %v266_v12 = vstv %s838_s28 }
  0xdd   :  { %v135_v40 = vpop.xlane.xlu1 %134  ;;  %v129_v41 = vpop.xlane.xlu0 %128 }
  0xde   :  { %v226_v45 = vrot.slane %v129_v41, %v186_v42  ;;  %v234_v47 = vrot.slane %v135_v40, %v186_v42  ;;  %v88_v40 = vld [vmem:[#allocation8 + $0x18] sm:$0xff] }
  0xdf   :  { %v805_v41 = vpack.c.bf16 %v88_v40, %v87_v39 }
  0xe1   :  { %v138_v43 = vpop.xlane.xlu1 %137  ;;  %v132_v44 = vpop.xlane.xlu0 %131  ;;  %806 = vmatpush3.bf16.msra.mxu0 %v805_v41 }
  0xe2   :  { %v230_v46 = vrot.slane %v132_v44, %v186_v42  ;;  %v238_v48 = vrot.slane %v138_v43, %v186_v42  ;;  %807 = vmatprep.subr.bf16.mxu0 %v1020_v35  ;;  %v90_v43 = vld [vmem:[#allocation8 + $0x28] sm:$0xff] }
  0xe4   :  { %v255_v49 = vsel %vm188_vm2, %v230_v46, %v226_v45  ;;  %v299_v45 = vsub.s32 1, %v1168_v38  ;;  %v292_v46 = vsub.s32 0, %v1168_v38 }
  0xe5   :  { %v256_v50 = vsel %vm189_vm3, %v234_v47, %v255_v49  ;;  %v144_v51 = vpop.xlane.xlu1 %143  ;;  %v141_v52 = vpop.xlane.xlu0 %140  ;;  %v91_v49 = vld [vmem:[#allocation8 + $0x30] sm:$0xff] }
  0xe6   :  { %v257_v53 = vsel %vm191_vm4, %v238_v48, %v256_v50  ;;  %v242_v54 = vrot.slane %v141_v52, %v186_v42  ;;  %v246_v55 = vrot.slane %v144_v51, %v186_v42  ;;  %v92_v50 = vld [vmem:[#allocation8 + $0x38] sm:$0xff] }
  0xe7   :  { %v811_v51 = vpack.c.bf16 %v92_v50, %v91_v49 }
  0xe8   :  { %v258_v56 = vsel %vm193_vm5, %v242_v54, %v257_v53  ;;  %v306_v54 = vsub.s32 2, %v1168_v38 }
  0xe9   :  { %v150_v57 = vpop.xlane.xlu1 %149  ;;  %v147_v58 = vpop.xlane.xlu0 %146  ;;  %v259_v62 = vsel %vm195_vm6, %v246_v55, %v258_v56  ;;  %v320_v55 = vsub.s32 4, %v1168_v38  ;;  %v93_v56 = vld [vmem:[#allocation8 + $0x40] sm:$0xff] }
  0xea   :  { %v250_v60 = vrot.slane %v147_v58, %v186_v42  ;;  %v254_v61 = vrot.slane %v150_v57, %v186_v42  ;;  %v94_v57 = vld [vmem:[#allocation8 + $0x48] sm:$0xff] }
  0xeb   :  { %v814_v58 = vpack.c.bf16 %v94_v57, %v93_v56  ;;  %v97_v57 = vld [vmem:[#allocation8 + $0x60] sm:$0xff] }
  0xec   :  { %v260_v63 = vsel %vm197_vm7, %v250_v60, %v259_v62  ;;  %v334_v62 = vsub.s32 6, %v1168_v38 }
  0xed   :  { %v180_v1 = vpop.xlane.xlu1 %179  ;;  %v177_v3 = vpop.xlane.xlu0 %176  ;;  %v261_v11 = vsel %vm199_vm9, %v254_v61, %v260_v63  ;;  %v313_v61 = vsub.s32 3, %v1168_v38  ;;  %v95_v63 = vld [vmem:[#allocation8 + $0x50] sm:$0xff] }
  0xee   :  { %v206_v4 = vrot.slane %v180_v1, %v186_v42  ;;  %v187_v7 = vrot.slane %v177_v3, %v186_v42  ;;  %v89_v42 = vld [vmem:[#allocation8 + $0x20] sm:$0xff]  ;;  %v96_v1 = vld [vmem:[#allocation8 + $0x58] sm:$0xff] }
  0xef   :  { %v808_v44 = vpack.c.bf16 %v90_v43, %v89_v42  ;;  %v817_v3 = vpack.c.bf16 %v96_v1, %v95_v63  ;;  %v101_v63 = vld [vmem:[#allocation8 + $0x80] sm:$0xff]  ;;  %v102_v1 = vld [vmem:[#allocation8 + $0x88] sm:$0xff] }
  0xf0   :  { %v214_v8 = vsel %vm165_vm8, %v187_v7, %v206_v4 }
  0xf1   :  { %v263_v13 = vadd.f32 %v261_v11, %v214_v8  ;;  %809 = vmatpush3.bf16.msra.mxu0 %v808_v44  ;;  %v327_v8 = vsub.s32 5, %v1168_v38  ;;  %v1022_v11 = vmov 0.0  }
  0xf2   :  { %810 = vmatprep.subr.bf16.mxu0 %v1020_v35  ;;  %768 = vmatprep.mubr.msk.f32.mxu0 %vm1021_vm11, %v1022_v11 }
  0xf3   :  { %v268_v14 = vadd.f32 %v266_v12, %v263_v13  ;;  %787 = vmatprep.mubr.msk.f32.mxu1 %vm1021_vm11, %v1022_v11  ;;  %v341_v13 = vsub.s32 7, %v1168_v38 }
  0xf5   :  { %v269_v15 = vmax.f32 %v268_v14, 0.0  ;;  %812 = vmatpush3.bf16.msra.mxu0 %v811_v51 }
  0xf6   :  { %813 = vmatprep.subr.bf16.mxu0 %v1020_v35 }
  0xf7   :  { %v271_v16 = vsel %vm270_vm10, %v269_v15, -inf }
  0xf8   :  { %v272_v17 = vrot.slane %v271_v16, 4 }
  0xf9   :  { %815 = vmatpush3.bf16.msra.mxu0 %v814_v58  ;;  %v98_v58 = vld [vmem:[#allocation8 + $0x68] sm:$0xff] }
  0xfa   :  { %v273_v20 = vmax.f32 %v271_v16, %v272_v17  ;;  %816 = vmatprep.subr.bf16.mxu0 %v1020_v35 }
  0xfc   :  { %v274_v21 = vrot.slane %v273_v20, 2 }
  0xfd   :  { %818 = vmatpush3.bf16.msra.mxu0 %v817_v3  ;;  %v826_v3 = vpack.c.bf16 %v102_v1, %v101_v63 }
  0xfe   :  { %v275_v22 = vmax.f32 %v273_v20, %v274_v21 }
 0x100   :  { %v276_v23 = vrot.slane %v275_v22, 1 }
 0x102   :  { %v277_v24 = vmax.f32 %v275_v22, %v276_v23 }
 0x104   :  { %v278_v27 = vsub.f32 %v269_v15, %v277_v24 }
 0x106   :  { %v279_v28 = vmul.f32 1.442695, %v278_v27 }
 0x108   :  { %854 = vpow2.f32 %v279_v28 }
 0x112   :  { %v855_v29 = vpop.eup %854 }
 0x113   :  { %v281_v30 = vsel %vm270_vm10, %v855_v29, 0.0 }
 0x114   :  { %v282_v31 = vrot.slane %v281_v30, 4 }
 0x116   :  { %v283_v32 = vadd.f32 %v282_v31, %v281_v30 }
 0x118   :  { %v284_v33 = vrot.slane %v283_v32, 2 }
 0x11a   :  { %v285_v34 = vadd.f32 %v284_v33, %v283_v32 }
 0x11c   :  { %v286_v36 = vrot.slane %v285_v34, 1 }
 0x11e   :  { %v287_v37 = vadd.f32 %v286_v36, %v285_v34 }
 0x120   :  { %856 = vrcp.f32 %v287_v37 }
 0x12a   :  { %v857_v47 = vpop.eup %856 }
 0x12b   :  { %v289_v48 = vmul.f32 %v857_v47, %v855_v29 }
 0x12d   :  { %v300_v52 = vrot.slane %v289_v48, %v299_v45  ;;  %v293_v53 = vrot.slane %v289_v48, %v292_v46  ;;  %v307_v59 = vrot.slane %v289_v48, %v306_v54  ;;  %v321_v60 = vrot.slane %v289_v48, %v320_v55 }
 0x12e   :  { %v314_v4 = vrot.slane %v289_v48, %v313_v61  ;;  %v335_v7 = vrot.slane %v289_v48, %v334_v62  ;;  %v328_v12 = vrot.slane %v289_v48, %v327_v8  ;;  %v342_v14 = vrot.slane %v289_v48, %v341_v13  ;;  %v100_v61 = vld [vmem:[#allocation8 + $0x78] sm:$0xff] }
 0x12f   :  { %302 = vbcast.lane.b32.xlu1 %v300_v52, 256  ;;  %295 = vbcast.lane.b32.xlu0 %v293_v53, 256 }
 0x133   :  { %309 = vbcast.lane.b32.xlu1 %v307_v59, 256  ;;  %323 = vbcast.lane.b32.xlu0 %v321_v60, 256  ;;  %v99_v59 = vld [vmem:[#allocation8 + $0x70] sm:$0xff]  ;;  %v820_v60 = vpack.c.bf16 %v98_v58, %v97_v57 }
 0x134   :  { %v823_v62 = vpack.c.bf16 %v100_v61, %v99_v59 }
 0x135   :  { %821 = vmatpush3.bf16.msra.mxu1 %v820_v60 }
 0x136   :  { %822 = vmatprep.subr.bf16.mxu1 %v1020_v35 }
 0x137   :  { %316 = vbcast.lane.b32.xlu1 %v314_v4, 256  ;;  %337 = vbcast.lane.b32.xlu0 %v335_v7, 256  ;;  %v104_v4 = vld [vmem:[#allocation8 + $0x98] sm:$0xff] }
 0x139   :  { %824 = vmatpush3.bf16.msra.mxu1 %v823_v62 }
 0x13a   :  { %825 = vmatprep.subr.bf16.mxu1 %v1020_v35 }
 0x13b   :  { %330 = vbcast.lane.b32.xlu1 %v328_v12, 256  ;;  %370 = vrot.lane.b32.xlu0 %v1157_v26, %s1023_s29 }
 0x13d   :  { %827 = vmatpush3.bf16.msra.mxu1 %v826_v3 }
 0x13e   :  { %828 = vmatprep.subr.bf16.mxu1 %v1020_v35 }
 0x13f   :  { %344 = vbcast.lane.b32.xlu1 %v342_v14, 256 }
 0x1a1   :  { %v303_v15 = vpop.permute.xlu1 %302  ;;  %v296_v16 = vpop.permute.xlu0 %295 }
 0x1a2   :  { %v347_v17 = vmul.f32 %v303_v15, %v1127_v6  ;;  %v346_v20 = vmul.f32 %v296_v16, %v1121_v2 }
 0x1a4   :  { %v355_v23 = vsel %vm126_vm0, %v347_v17, 0.0  ;;  %v354_v24 = vsel %vm126_vm0, %v346_v20, 0.0 }
 0x1a5   :  { %v310_v21 = vpop.permute.xlu1 %309  ;;  %v324_v22 = vpop.permute.xlu0 %323  ;;  %v356_v28 = vadd.f32 %v355_v23, %v354_v24 }
 0x1a6   :  { %v348_v38 = vmul.f32 %v310_v21, %v1116_v0  ;;  %v350_v30 = vmul.f32 %v324_v22, %v1133_v10  ;;  %v712_v22 = vld [vmem:[%s1268_s4] ss:$0 sm:$0xff] }
 0x1a8   :  { %v357_v27 = vsel %vm126_vm0, %v348_v38, 0.0  ;;  %v361_v36 = vsel %vm126_vm0, %v350_v30, 0.0 }
 0x1a9   :  { %v317_v29 = vpop.permute.xlu1 %316  ;;  %v358_v32 = vadd.f32 %v357_v27, %v356_v28  ;;  %v338_v6 = vpop.permute.xlu0 %337 }
 0x1aa   :  { %v349_v31 = vmul.f32 %v317_v29, %v1125_v5  ;;  %v352_v37 = vmul.f32 %v338_v6, %v1146_v19 }
 0x1ac   :  { %v359_v2 = vsel %vm126_vm0, %v349_v31, 0.0  ;;  %v365_v10 = vsel %vm126_vm0, %v352_v37, 0.0  ;;  %v108_v37 = vld [vmem:[#allocation8 + $0xb8] sm:$0xff] }
 0x1ad   :  { %v360_v33 = vadd.f32 %v359_v2, %v358_v32  ;;  %v331_v34 = vpop.permute.xlu1 %330  ;;  %v371_v45 = vpop.permute.xlu0 %370  ;;  %v105_v2 = vld [vmem:[#allocation8 + $0xa0] sm:$0xff] }
 0x1ae   :  { %v351_v0 = vmul.f32 %v331_v34, %v1131_v9  ;;  %v375_v9 = vld [vmem:[#allocation2] sm:$0x3]  ;;  %v107_v34 = vld [vmem:[#allocation8 + $0xb0] sm:$0xff] }
 0x1af   :  { %v362_v39 = vadd.f32 %v361_v36, %v360_v33  ;;  %v106_v33 = vld [vmem:[#allocation8 + $0xa8] sm:$0xff] }
 0x1b0   :  { %v363_v40 = vsel %vm126_vm0, %v351_v0, 0.0  ;;  %v832_v36 = vpack.c.bf16 %v106_v33, %v105_v2  ;;  %v835_v0 = vpack.c.bf16 %v108_v37, %v107_v34 }
 0x1b1   :  { %v364_v41 = vadd.f32 %v363_v40, %v362_v39  ;;  %v345_v42 = vpop.permute.xlu1 %344 }
 0x1b2   :  { %v353_v5 = vmul.f32 %v345_v42, %v1144_v18 }
 0x1b3   :  { %v366_v43 = vadd.f32 %v365_v10, %v364_v41 }
 0x1b4   :  { %v367_v44 = vsel %vm126_vm0, %v353_v5, 0.0 }
 0x1b5   :  { %v368_v46 = vadd.f32 %v367_v44, %v366_v43 }
 0x1b7   :  { %v374_v19 = vsel %vm373_vm12, %v368_v46, %v371_v45 }
 0x1b8   :  { %769 = vmatmul.mubr.msk.f32.vlgmr.msra.gmra.mrb[0].mxu0 %vm376_vm13, %v374_v19 }
 0x28b   :  { %v446_v47 = vpop.f32.mrb[0].mxu0 }
 0x28c   :  { %v447_v48 = vadd.f32 %v446_v47, %v375_v9  ;;  %v770_v49 = vpop.f32.mrb[1].mxu0 }
 0x28e   :  { %457 = vrot.lane.b32.xlu1 %v447_v48, %s1013_s7  ;;  %v711_v50 = vmul.f32 -1.442695, %v447_v48 }
 0x290   :  { %858 = vpow2.f32 %v711_v50 }
 0x29a   :  { %v859_v51 = vpop.eup %858 }
 0x29b   :  { %v453_v18 = vadd.f32 1.0, %v859_v51 }
 0x29d   :  { %860 = vrcp.f32 %v453_v18 }
 0x2a7   :  { %v861_v52 = vpop.eup %860 }
 0x2a8   :  { %v467_v12 = vsub.f32 1.0, %v861_v52 }
 0x300   :  { %v458_v53 = vpop.permute.xlu1 %457 }
 0x301   :  { %v460_v54 = vmul.f32 %v861_v52, %v458_v53 }
 0x303   :  { %462 = vrot.lane.b32.xlu0 %v460_v54, %s1023_s29 }
 0x307   :  { %473 = vrot.lane.b32.xlu0 %v1157_v26, %s1013_s7 }
 0x30b   :  { %483 = vrot.lane.b32.xlu0 %v1155_v25, %s1013_s7  ;;  %v103_v25 = vld [vmem:[#allocation8 + $0x90] sm:$0xff] }
 0x30c   :  { %v829_v7 = vpack.c.bf16 %v104_v4, %v103_v25 }
 0x30e   :  { %830 = vmatpush3.bf16.msra.mxu1 %v829_v7 }
 0x30f   :  { %831 = vmatprep.subr.bf16.mxu1 %v1020_v35 }
 0x375   :  { %v463_v55 = vpop.permute.xlu0 %462 }
 0x376   :  { %v465_v56 = vadd.f32 %v463_v55, %v447_v48 }
 0x378   :  { %862 = vtanh.f32 %v465_v56 }
 0x379   :  { %v474_v8 = vpop.permute.xlu0 %473 }
 0x37a   :  { %v476_v14 = vmul.f32 %v861_v52, %v474_v8 }
 0x37d   :  { %v484_v17 = vpop.permute.xlu0 %483 }
 0x382   :  { %v863_v26 = vpop.eup %862 }
 0x383   :  { %469 = vrot.lane.b32.xlu1 %v863_v26, %s1024_s30 }
 0x3f5   :  { %v470_v13 = vpop.permute.xlu1 %469 }
 0x3f6   :  { %v472_v15 = vmul.f32 %v470_v13, %v467_v12 }
 0x3f8   :  { %v477_v16 = vadd.f32 %v476_v14, %v472_v15 }
 0x3fa   :  { %479 = vrot.lane.b32.xlu1 %v477_v16, %s1024_s30 }
 0x46c   :  { %v480_v20 = vpop.permute.xlu1 %479 }
 0x46d   :  { %673 = vst.msk [vmem:[#allocation11] sm:$0x3] %vm174_vm1, %v480_v20  ;;  %v487_v21 = vsel %vm486_vm14, %v480_v20, %v484_v17 }
 0x46e   :  { %788 = vmatmul.mubr.msk.f32.vlgmr.msra.gmra.mrb[0].mxu1 %vm373_vm12, %v487_v21 }
 0x46f   :  { %798 = vmatprep.mubr.msk.f32.mxu1 %vm1021_vm11, %v1022_v11  ;;  %833 = vmatpush3.bf16.msra.mxu1 %v832_v36 }
 0x470   :  { %834 = vmatprep.subr.bf16.mxu1 %v1020_v35 }
 0x473   :  { %836 = vmatpush3.bf16.msra.mxu1 %v835_v0 }
 0x541   :  { %v561_v23 = vpop.f32.mrb[0].mxu1 }
 0x542   :  { %v562_v24 = vadd.f32 %v712_v22, %v561_v23  ;;  %v789_v38 = vpop.f32.mrb[1].mxu1 }
 0x544   :  { %572 = vrot.lane.b32.xlu1 %v562_v24, %s1013_s7  ;;  %v714_v27 = vmul.f32 -1.442695, %v562_v24 }
 0x546   :  { %864 = vpow2.f32 %v714_v27 }
 0x550   :  { %v865_v28 = vpop.eup %864 }
 0x551   :  { %v568_v29 = vadd.f32 1.0, %v865_v28 }
 0x553   :  { %866 = vrcp.f32 %v568_v29 }
 0x55d   :  { %v867_v30 = vpop.eup %866 }
 0x55e   :  { %v582_v40 = vsub.f32 1.0, %v867_v30  ;;  %v588_v42 = vmul.f32 %v867_v30, %v484_v17 }
 0x5b6   :  { %v573_v31 = vpop.permute.xlu1 %572 }
 0x5b7   :  { %v575_v32 = vmul.f32 %v867_v30, %v573_v31 }
 0x5b9   :  { %577 = vrot.lane.b32.xlu0 %v575_v32, %s1023_s29 }
 0x62b   :  { %v578_v11 = vpop.permute.xlu0 %577 }
 0x62c   :  { %v580_v6 = vadd.f32 %v578_v11, %v562_v24 }
 0x62e   :  { %868 = vtanh.f32 %v580_v6 }
 0x638   :  { %v869_v39 = vpop.eup %868 }
 0x639   :  { %584 = vrot.lane.b32.xlu1 %v869_v39, %s1024_s30 }
 0x6ab   :  { %v585_v41 = vpop.permute.xlu1 %584 }
 0x6ac   :  { %v587_v10 = vmul.f32 %v585_v41, %v582_v40 }
 0x6ae   :  { %v589_v5 = vadd.f32 %v588_v42, %v587_v10 }
 0x6b0   :  { %595 = vrot.lane.b32.xlu0 %v589_v5, %s1024_s30 }
 0x722   :  { %v596_v43 = vpop.permute.xlu0 %595 }
 0x723   :  { %674 = vst.msk [vmem:[#allocation11 + $0x2] sm:$0x3] %vm174_vm1, %v596_v43  ;;  %799 = vmatmul.mubr.msk.f32.vlgmr.msra.gmra.mrb[2].mxu1 %vm486_vm14, %v596_v43 }
 0x724   :  { %969 = shalt.err (!%p966_p8)
}
 0x725   :  { %s970_s16 = scalar_lea.hbm %s1270_s6, 64 }
 0x726   :  { %p971_p9 = scmp.ne.s32.totalorder %s1270_s6, %s970_s16  ;;  %p974_p10 = scmp.lt.u32.totalorder %s970_s16, %s1270_s6 }
 0x728   :  { %p976_p11 = pnand %p974_p10, %p971_p9 }
 0x72a   :  { %979 = shalt.err (!%p976_p11)
}
 0x72b   :  { %696 = dma.vmem_to_hbm [thread:$0]  %s691_s11, 64, %s1270_s6, [#allocation12], %s1013_s7, %s1013_s7, %s1014_s8   ;;  %vm669_vm15 = vcmask 1041408  }
 0x72c   :  { %v715_v35 = vld [vmem:[%s1268_s4 + $0x1] ss:$0 sm:$0xff]  ;;  %s1026_s22 = smov [#allocation10]  }
 0x72d   :  { %s681_s23 = sshll.u32 %s1026_s22, 4  ;;  %s682_s23 = int_to_ptr.vmem [resolvable:$true] %s681_s23 }
 0x72e   :  { %s980_s24 = scalar_lea.vmem %s682_s23, 128  ;;  %p985_p13 = scmp.lt.s32.totalorder %s682_s23, %s682_s23 }
 0x72f   :  { %p981_p12 = scmp.ne.s32.totalorder %s682_s23, %s980_s24  ;;  %p986_p0 = scmp.lt.s32.totalorder %s980_s24, %s980_s24 }
 0x731   :  { %p987_p1 = por %p986_p0, %p985_p13 }
 0x733   :  { %p988_p2 = pnand %p987_p1, %p981_p12 }
 0x7f6   :  { %v665_v44 = vpop.f32.mrb[2].mxu1 }
 0x7f7   :  { %v666_v45 = vadd.f32 %v715_v35, %v665_v44  ;;  %v800_v46 = vpop.f32.mrb[3].mxu1 }
 0x7f9   :  { %v670_v19 = vsel %vm669_vm15, %v666_v45, 0.0 }
 0x7fa   :  { %671 = vst [vmem:[#allocation10] sm:$0xff] %v670_v19 }
 0x7fb   :  { %991 = shalt.err (!%p988_p2)
}
 0x7fc   :  { %s992_s4 = scalar_lea.hbm %s1269_s5, 128 }
 0x7fd   :  { %p993_p3 = scmp.ne.s32.totalorder %s1269_s5, %s992_s4  ;;  %p996_p4 = scmp.lt.u32.totalorder %s992_s4, %s1269_s5 }
 0x7ff   :  { %p998_p5 = pnand %p996_p4, %p993_p3 }
 0x801   :  { %1001 = shalt.err (!%p998_p5)
}
 0x802   :  { %684 = dma.vmem_to_hbm [thread:$0]  %s682_s23, 128, %s1269_s5, [#allocation4]  }
 0x803   :  { %1008 = dma.done.wait [#allocation4], 128  }
 0x804   :  { %1009 = vsyncadd [#allocation4], 4294967168 }
 0x805   :  { %1010 = dma.done.wait [#allocation12], 64  }
 0x806   :  { %1011 = vsyncadd [#allocation12], 4294967232 }
 0x807   :  { %703 = vsyncpa [#allocation3], 1 }
 0x808   :  { %704 = vsyncpa [#allocation6], 1 }
 0x809   :  { %705 = vsyncpa [#allocation9], 1 }
 0x80a   :  { %706 = vsyncpa [#allocation4], 1 }
 0x80b   :  { %707 = vsyncpa [#allocation12], 1 }

</bundles_post_ra>
